<compile_context>
chip_gen: v7x
topology: tpu7x:2x2x1
jax: 0.10.0
libtpu: 0.0.40
codegen_flags: <defaults>
</compile_context>

<pallas_src>
import functools

import jax
import jax.numpy as jnp
from jax.experimental import pallas as pl
from jax.experimental.pallas import tpu as pltpu


# ----------------------------------------------------------------------------
# Fused kernel: k*k accumulated tap-matmuls -> bias -> GLU, lane-dense output.
# ----------------------------------------------------------------------------
def _gated_conv_kernel(x_ref, w_ref, b_ref, o_ref, *, k, dilation, wp, lout, cout):
    # x_ref: (1, Cin, FL)       bf16 flattened padded image (lane axis = flat spatial)
    # w_ref: (k*k, 2*Cout, Cin) bf16 per-tap weight matrices (VMEM-resident)
    # b_ref: (2*Cout, 1)        f32 bias
    # o_ref: (1, Cout, Lout)    f32, Lout = Ho1 * Wp (lane-dense store)
    c2 = 2 * cout
    acc = jnp.zeros((c2, lout), jnp.float32)

    # "Wide-row" conv: a tap (kh, kw) is a flat lane shift of kh*dil*Wp + kw*dil.
    # Columns j >= Wo of each output row are garbage and dropped by the wrapper.
    for kh in range(k):
        for kw in range(k):
            t = kh * k + kw
            off = kh * dilation * wp + kw * dilation
            slab = x_ref[0, :, off:off + lout]                  # (Cin, Lout) bf16
            acc = acc + jnp.dot(w_ref[t], slab,
                                preferred_element_type=jnp.float32)

    acc = acc + b_ref[...]                                      # f32 bias (lane bcast)

    # GLU along channels (torch F.glu(dim=1)); sigmoid via EUP exp + approx vrcp.
    val = acc[:cout, :]
    gate = acc[cout:, :]
    gated = val * pl.reciprocal(1.0 + jnp.exp(-gate), approx=True)
    o_ref[0] = gated.astype(o_ref.dtype)


# ----------------------------------------------------------------------------
# Wrapper: layout plumbing (no transposes, no HBM im2col) + pallas_call
# ----------------------------------------------------------------------------
def gated_conv2d(x_nchw, w_oihw, b, *, stride=1, padding=1, dilation=1):
    """x: (N, Cin, H, W) f32; w: torch OIHW (2*Cout, Cin, k, k); b: (2*Cout,)."""
    n, cin, h, w = x_nchw.shape
    c2, cin_w, kh_, kw_ = w_oihw.shape
    assert kh_ == kw_ and cin_w == cin and c2 % 2 == 0
    k = kh_
    cout = c2 // 2

    # Dense (stride-1) output extent; stride>1 handled by subsampling at the end.
    ho1 = h + 2 * padding - dilation * (k - 1)
    wo1 = w + 2 * padding - dilation * (k - 1)
    assert ho1 > 0 and wo1 > 0
    hp, wp = h + 2 * padding, w + 2 * padding

    lout = ho1 * wp                              # flat output length per image
    max_off = (k - 1) * dilation * (wp + 1)      # largest tap lane-offset
    fl = max_off + lout                          # = hp*wp + (k-1)*dilation

    # Cheap layout work (bf16 cast first so the pads copy half the bytes):
    x_bf16 = x_nchw.astype(jnp.bfloat16)
    x_pad = jnp.pad(x_bf16, ((0, 0), (0, 0), (padding, padding), (padding, padding)))
    x_flat = x_pad.reshape(n, cin, hp * wp)
    x_flat = jnp.pad(x_flat, ((0, 0), (0, 0), (0, fl - hp * wp)))   # tail zeros

    # OIHW -> (k, k, 2Cout, Cin) -> (k*k, 2Cout, Cin); tap order matches kernel loop.
    w_taps = (jnp.transpose(w_oihw, (2, 3, 0, 1))
              .reshape(k * k, c2, cin).astype(jnp.bfloat16))
    b2 = b.reshape(c2, 1).astype(jnp.float32)

    kernel = functools.partial(_gated_conv_kernel, k=k, dilation=dilation,
                               wp=wp, lout=lout, cout=cout)

    out_flat = pl.pallas_call(
        kernel,
        grid=(n,),
        in_specs=[
            pl.BlockSpec((1, cin, fl), lambda i: (i, 0, 0)),          # per-image tile
            pl.BlockSpec((k * k, c2, cin), lambda i: (0, 0, 0)),      # resident weights
            pl.BlockSpec((c2, 1), lambda i: (0, 0)),                  # resident bias
        ],
        out_specs=pl.BlockSpec((1, cout, lout), lambda i: (i, 0, 0)),
        out_shape=jax.ShapeDtypeStruct((n, cout, lout), jnp.float32),
        compiler_params=pltpu.CompilerParams(
            dimension_semantics=("parallel",)),    # batch across v7x TensorCores
    )(x_flat, w_taps, b2)

    # Free reshape; cheap slice drops the (k-1)*dilation garbage cols per row.
    out = out_flat.reshape(n, cout, ho1, wp)[..., :wo1]
    if stride > 1:
        # TODO(synk): stride>1 computes the dense map and subsamples (correct but
        # wasteful); a dedicated strided kernel would avoid the extra compute.
        out = out[:, :, ::stride, ::stride]
    return out


# ----------------------------------------------------------------------------
# Pure-JAX reference (correctness check only)
# ----------------------------------------------------------------------------
def _gated_conv2d_ref(x_nchw, w_oihw, b, stride, padding, dilation):
    temps = jax.lax.conv_general_dilated(
        x_nchw, w_oihw, (stride, stride),
        [(padding, padding), (padding, padding)],
        rhs_dilation=(dilation, dilation),
        dimension_numbers=("NCHW", "OIHW", "NCHW"))
    temps = temps + b[None, :, None, None]
    c = temps.shape[1] // 2
    return temps[:, :c] * jax.nn.sigmoid(temps[:, c:])


# ----------------------------------------------------------------------------
if __name__ == "__main__":
    key = jax.random.PRNGKey(0)
    kx, kw_, kb_ = jax.random.split(key, 3)

    # Small shapes consistent with the module: batch=2, in_channels=4, 16x16,
    # out_channels=8, kernel=3, stride=1, padding=1 (conv emits 2*out_channels).
    n, cin, h, w = 2, 4, 16, 16
    cout, k, stride, padding, dilation = 8, 3, 1, 1, 1

    x = jax.random.normal(kx, (n, cin, h, w), jnp.float32)
    fan_in = cin * k * k
    bound = 1.0 / float(fan_in) ** 0.5               # PyTorch Conv2d default init
    w_oihw = jax.random.uniform(kw_, (2 * cout, cin, k, k), jnp.float32, -bound, bound)
    b = jax.random.uniform(kb_, (2 * cout,), jnp.float32, -bound, bound)

    out = gated_conv2d(x, w_oihw, b, stride=stride, padding=padding,
                       dilation=dilation)
    out = jax.block_until_ready(out)

    ref = _gated_conv2d_ref(x, w_oihw, b, stride, padding, dilation)
    assert out.shape == ref.shape == (n, cout, h, w), out.shape
    err = float(jnp.max(jnp.abs(out - ref)))
    scale = float(jnp.max(jnp.abs(ref))) + 1.0
    assert err < 3e-2 * scale, f"max abs error {err} vs ref scale {scale}"
    print("KERNEL_OK")
</pallas_src>

<mosaic_0001>
module attributes {stable_mosaic.version = 11 : i64} {
  func.func @_gated_conv_kernel(%arg0: i32, %arg1: memref<1x4x326xbf16, #tpu.memory_space<vmem>>, %arg2: memref<9x16x4xbf16, #tpu.memory_space<vmem>>, %arg3: memref<16x1xf32, #tpu.memory_space<vmem>>, %arg4: memref<1x8x288xf32, #tpu.memory_space<vmem>>) attributes {dimension_semantics = [#tpu.dimension_semantics<parallel>], iteration_bounds = array<i64: 2>, scalar_prefetch = 0 : i64, scratch_operands = 0 : i64, tpu.core_type = #tpu.core_type<tc>, window_params = [{transform_indices = @transform_0, window_bounds = array<i64: 1, 4, 326>}, {pipeline_mode = #tpu.pipeline_mode<synchronous>, transform_indices = @transform_1, window_bounds = array<i64: 9, 16, 4>}, {pipeline_mode = #tpu.pipeline_mode<synchronous>, transform_indices = @transform_2, window_bounds = array<i64: 16, 1>}, {transform_indices = @transform_3, window_bounds = array<i64: 1, 8, 288>}]} {
    %cst = arith.constant 0.000000e+00 : f32
    %0 = vector.broadcast %cst : f32 to vector<16x288xf32>
    %c0 = arith.constant 0 : index
    %c0_0 = arith.constant 0 : index
    %c0_1 = arith.constant 0 : index
    %1 = vector.load %arg1[%c0, %c0_0, %c0_1] : memref<1x4x326xbf16, #tpu.memory_space<vmem>>, vector<1x4x288xbf16>
    %2 = vector.shape_cast %1 : vector<1x4x288xbf16> to vector<4x288xbf16>
    %c0_2 = arith.constant 0 : index
    %c0_3 = arith.constant 0 : index
    %c0_4 = arith.constant 0 : index
    %3 = vector.load %arg2[%c0_2, %c0_3, %c0_4] : memref<9x16x4xbf16, #tpu.memory_space<vmem>>, vector<1x16x4xbf16>
    %4 = vector.shape_cast %3 : vector<1x16x4xbf16> to vector<16x4xbf16>
    %cst_5 = arith.constant dense<0.000000e+00> : vector<16x288xf32>
    %5 = tpu.matmul %4, %2, %cst_5 {dimension_numbers = #tpu.dot_dimension_numbers<[1], [0], [0], [1], [0, 0, 1, 1], [], []>} : vector<16x4xbf16>, vector<4x288xbf16>, vector<16x288xf32> -> vector<16x288xf32>
    %6 = arith.addf %0, %5 : vector<16x288xf32>
    %c0_6 = arith.constant 0 : index
    %c0_7 = arith.constant 0 : index
    %c1 = arith.constant 1 : index
    %7 = vector.load %arg1[%c0_6, %c0_7, %c1] : memref<1x4x326xbf16, #tpu.memory_space<vmem>>, vector<1x4x288xbf16>
    %8 = vector.shape_cast %7 : vector<1x4x288xbf16> to vector<4x288xbf16>
    %c1_8 = arith.constant 1 : index
    %c0_9 = arith.constant 0 : index
    %c0_10 = arith.constant 0 : index
    %9 = vector.load %arg2[%c1_8, %c0_9, %c0_10] : memref<9x16x4xbf16, #tpu.memory_space<vmem>>, vector<1x16x4xbf16>
    %10 = vector.shape_cast %9 : vector<1x16x4xbf16> to vector<16x4xbf16>
    %cst_11 = arith.constant dense<0.000000e+00> : vector<16x288xf32>
    %11 = tpu.matmul %10, %8, %cst_11 {dimension_numbers = #tpu.dot_dimension_numbers<[1], [0], [0], [1], [0, 0, 1, 1], [], []>} : vector<16x4xbf16>, vector<4x288xbf16>, vector<16x288xf32> -> vector<16x288xf32>
    %12 = arith.addf %6, %11 : vector<16x288xf32>
    %c0_12 = arith.constant 0 : index
    %c0_13 = arith.constant 0 : index
    %c2 = arith.constant 2 : index
    %13 = vector.load %arg1[%c0_12, %c0_13, %c2] : memref<1x4x326xbf16, #tpu.memory_space<vmem>>, vector<1x4x288xbf16>
    %14 = vector.shape_cast %13 : vector<1x4x288xbf16> to vector<4x288xbf16>
    %c2_14 = arith.constant 2 : index
    %c0_15 = arith.constant 0 : index
    %c0_16 = arith.constant 0 : index
    %15 = vector.load %arg2[%c2_14, %c0_15, %c0_16] : memref<9x16x4xbf16, #tpu.memory_space<vmem>>, vector<1x16x4xbf16>
    %16 = vector.shape_cast %15 : vector<1x16x4xbf16> to vector<16x4xbf16>
    %cst_17 = arith.constant dense<0.000000e+00> : vector<16x288xf32>
    %17 = tpu.matmul %16, %14, %cst_17 {dimension_numbers = #tpu.dot_dimension_numbers<[1], [0], [0], [1], [0, 0, 1, 1], [], []>} : vector<16x4xbf16>, vector<4x288xbf16>, vector<16x288xf32> -> vector<16x288xf32>
    %18 = arith.addf %12, %17 : vector<16x288xf32>
    %c0_18 = arith.constant 0 : index
    %c0_19 = arith.constant 0 : index
    %c18 = arith.constant 18 : index
    %19 = vector.load %arg1[%c0_18, %c0_19, %c18] : memref<1x4x326xbf16, #tpu.memory_space<vmem>>, vector<1x4x288xbf16>
    %20 = vector.shape_cast %19 : vector<1x4x288xbf16> to vector<4x288xbf16>
    %c3 = arith.constant 3 : index
    %c0_20 = arith.constant 0 : index
    %c0_21 = arith.constant 0 : index
    %21 = vector.load %arg2[%c3, %c0_20, %c0_21] : memref<9x16x4xbf16, #tpu.memory_space<vmem>>, vector<1x16x4xbf16>
    %22 = vector.shape_cast %21 : vector<1x16x4xbf16> to vector<16x4xbf16>
    %cst_22 = arith.constant dense<0.000000e+00> : vector<16x288xf32>
    %23 = tpu.matmul %22, %20, %cst_22 {dimension_numbers = #tpu.dot_dimension_numbers<[1], [0], [0], [1], [0, 0, 1, 1], [], []>} : vector<16x4xbf16>, vector<4x288xbf16>, vector<16x288xf32> -> vector<16x288xf32>
    %24 = arith.addf %18, %23 : vector<16x288xf32>
    %c0_23 = arith.constant 0 : index
    %c0_24 = arith.constant 0 : index
    %c19 = arith.constant 19 : index
    %25 = vector.load %arg1[%c0_23, %c0_24, %c19] : memref<1x4x326xbf16, #tpu.memory_space<vmem>>, vector<1x4x288xbf16>
    %26 = vector.shape_cast %25 : vector<1x4x288xbf16> to vector<4x288xbf16>
    %c4 = arith.constant 4 : index
    %c0_25 = arith.constant 0 : index
    %c0_26 = arith.constant 0 : index
    %27 = vector.load %arg2[%c4, %c0_25, %c0_26] : memref<9x16x4xbf16, #tpu.memory_space<vmem>>, vector<1x16x4xbf16>
    %28 = vector.shape_cast %27 : vector<1x16x4xbf16> to vector<16x4xbf16>
    %cst_27 = arith.constant dense<0.000000e+00> : vector<16x288xf32>
    %29 = tpu.matmul %28, %26, %cst_27 {dimension_numbers = #tpu.dot_dimension_numbers<[1], [0], [0], [1], [0, 0, 1, 1], [], []>} : vector<16x4xbf16>, vector<4x288xbf16>, vector<16x288xf32> -> vector<16x288xf32>
    %30 = arith.addf %24, %29 : vector<16x288xf32>
    %c0_28 = arith.constant 0 : index
    %c0_29 = arith.constant 0 : index
    %c20 = arith.constant 20 : index
    %31 = vector.load %arg1[%c0_28, %c0_29, %c20] : memref<1x4x326xbf16, #tpu.memory_space<vmem>>, vector<1x4x288xbf16>
    %32 = vector.shape_cast %31 : vector<1x4x288xbf16> to vector<4x288xbf16>
    %c5 = arith.constant 5 : index
    %c0_30 = arith.constant 0 : index
    %c0_31 = arith.constant 0 : index
    %33 = vector.load %arg2[%c5, %c0_30, %c0_31] : memref<9x16x4xbf16, #tpu.memory_space<vmem>>, vector<1x16x4xbf16>
    %34 = vector.shape_cast %33 : vector<1x16x4xbf16> to vector<16x4xbf16>
    %cst_32 = arith.constant dense<0.000000e+00> : vector<16x288xf32>
    %35 = tpu.matmul %34, %32, %cst_32 {dimension_numbers = #tpu.dot_dimension_numbers<[1], [0], [0], [1], [0, 0, 1, 1], [], []>} : vector<16x4xbf16>, vector<4x288xbf16>, vector<16x288xf32> -> vector<16x288xf32>
    %36 = arith.addf %30, %35 : vector<16x288xf32>
    %c0_33 = arith.constant 0 : index
    %c0_34 = arith.constant 0 : index
    %c36 = arith.constant 36 : index
    %37 = vector.load %arg1[%c0_33, %c0_34, %c36] : memref<1x4x326xbf16, #tpu.memory_space<vmem>>, vector<1x4x288xbf16>
    %38 = vector.shape_cast %37 : vector<1x4x288xbf16> to vector<4x288xbf16>
    %c6 = arith.constant 6 : index
    %c0_35 = arith.constant 0 : index
    %c0_36 = arith.constant 0 : index
    %39 = vector.load %arg2[%c6, %c0_35, %c0_36] : memref<9x16x4xbf16, #tpu.memory_space<vmem>>, vector<1x16x4xbf16>
    %40 = vector.shape_cast %39 : vector<1x16x4xbf16> to vector<16x4xbf16>
    %cst_37 = arith.constant dense<0.000000e+00> : vector<16x288xf32>
    %41 = tpu.matmul %40, %38, %cst_37 {dimension_numbers = #tpu.dot_dimension_numbers<[1], [0], [0], [1], [0, 0, 1, 1], [], []>} : vector<16x4xbf16>, vector<4x288xbf16>, vector<16x288xf32> -> vector<16x288xf32>
    %42 = arith.addf %36, %41 : vector<16x288xf32>
    %c0_38 = arith.constant 0 : index
    %c0_39 = arith.constant 0 : index
    %c37 = arith.constant 37 : index
    %43 = vector.load %arg1[%c0_38, %c0_39, %c37] : memref<1x4x326xbf16, #tpu.memory_space<vmem>>, vector<1x4x288xbf16>
    %44 = vector.shape_cast %43 : vector<1x4x288xbf16> to vector<4x288xbf16>
    %c7 = arith.constant 7 : index
    %c0_40 = arith.constant 0 : index
    %c0_41 = arith.constant 0 : index
    %45 = vector.load %arg2[%c7, %c0_40, %c0_41] : memref<9x16x4xbf16, #tpu.memory_space<vmem>>, vector<1x16x4xbf16>
    %46 = vector.shape_cast %45 : vector<1x16x4xbf16> to vector<16x4xbf16>
    %cst_42 = arith.constant dense<0.000000e+00> : vector<16x288xf32>
    %47 = tpu.matmul %46, %44, %cst_42 {dimension_numbers = #tpu.dot_dimension_numbers<[1], [0], [0], [1], [0, 0, 1, 1], [], []>} : vector<16x4xbf16>, vector<4x288xbf16>, vector<16x288xf32> -> vector<16x288xf32>
    %48 = arith.addf %42, %47 : vector<16x288xf32>
    %c0_43 = arith.constant 0 : index
    %c0_44 = arith.constant 0 : index
    %c38 = arith.constant 38 : index
    %49 = vector.load %arg1[%c0_43, %c0_44, %c38] : memref<1x4x326xbf16, #tpu.memory_space<vmem>>, vector<1x4x288xbf16>
    %50 = vector.shape_cast %49 : vector<1x4x288xbf16> to vector<4x288xbf16>
    %c8 = arith.constant 8 : index
    %c0_45 = arith.constant 0 : index
    %c0_46 = arith.constant 0 : index
    %51 = vector.load %arg2[%c8, %c0_45, %c0_46] : memref<9x16x4xbf16, #tpu.memory_space<vmem>>, vector<1x16x4xbf16>
    %52 = vector.shape_cast %51 : vector<1x16x4xbf16> to vector<16x4xbf16>
    %cst_47 = arith.constant dense<0.000000e+00> : vector<16x288xf32>
    %53 = tpu.matmul %52, %50, %cst_47 {dimension_numbers = #tpu.dot_dimension_numbers<[1], [0], [0], [1], [0, 0, 1, 1], [], []>} : vector<16x4xbf16>, vector<4x288xbf16>, vector<16x288xf32> -> vector<16x288xf32>
    %54 = arith.addf %48, %53 : vector<16x288xf32>
    %c0_48 = arith.constant 0 : index
    %c0_49 = arith.constant 0 : index
    %55 = vector.load %arg3[%c0_48, %c0_49] : memref<16x1xf32, #tpu.memory_space<vmem>>, vector<16x1xf32>
    %56 = vector.broadcast %55 : vector<16x1xf32> to vector<16x288xf32>
    %57 = arith.addf %54, %56 : vector<16x288xf32>
    %58 = vector.extract_strided_slice %57 {offsets = [0, 0], sizes = [8, 288], strides = [1, 1]} : vector<16x288xf32> to vector<8x288xf32>
    %59 = vector.extract_strided_slice %57 {offsets = [8, 0], sizes = [8, 288], strides = [1, 1]} : vector<16x288xf32> to vector<8x288xf32>
    %cst_50 = arith.constant 0.000000e+00 : f32
    %60 = vector.broadcast %cst_50 : f32 to vector<8x288xf32>
    %61 = arith.subf %60, %59 : vector<8x288xf32>
    %62 = math.exp %61 : vector<8x288xf32>
    %cst_51 = arith.constant 1.000000e+00 : f32
    %63 = vector.broadcast %cst_51 : f32 to vector<8x288xf32>
    %64 = arith.addf %63, %62 : vector<8x288xf32>
    %65 = tpu.reciprocal %64 {approx = true} : vector<8x288xf32> -> vector<8x288xf32>
    %66 = arith.mulf %58, %65 : vector<8x288xf32>
    %c0_52 = arith.constant 0 : index
    %c0_53 = arith.constant 0 : index
    %c0_54 = arith.constant 0 : index
    %67 = vector.load %arg4[%c0_52, %c0_53, %c0_54] : memref<1x8x288xf32, #tpu.memory_space<vmem>>, vector<1x8x288xf32>
    %68 = vector.shape_cast %67 : vector<1x8x288xf32> to vector<8x288xf32>
    %69 = vector.shape_cast %66 : vector<8x288xf32> to vector<1x8x288xf32>
    tpu.vector_store %arg4[%c0_52, %c0_53, %c0_54], %69 {strides = array<i32>} : memref<1x8x288xf32, #tpu.memory_space<vmem>>, vector<1x8x288xf32>,
    return
  }
  func.func @transform_0(%arg0: i32) -> (i32, i32, i32) {
    %c0_i32 = arith.constant 0 : i32
    %c0_i32_0 = arith.constant 0 : i32
    %c0_i32_1 = arith.constant 0 : i32
    return %arg0, %c0_i32, %c0_i32_0 : i32, i32, i32
  }
  func.func @transform_1(%arg0: i32) -> (i32, i32, i32) {
    %c0_i32 = arith.constant 0 : i32
    %c0_i32_0 = arith.constant 0 : i32
    %c0_i32_1 = arith.constant 0 : i32
    %c0_i32_2 = arith.constant 0 : i32
    return %c0_i32, %c0_i32_0, %c0_i32_1 : i32, i32, i32
  }
  func.func @transform_2(%arg0: i32) -> (i32, i32) {
    %c0_i32 = arith.constant 0 : i32
    %c0_i32_0 = arith.constant 0 : i32
    %c0_i32_1 = arith.constant 0 : i32
    return %c0_i32, %c0_i32_0 : i32, i32
  }
  func.func @transform_3(%arg0: i32) -> (i32, i32, i32) {
    %c0_i32 = arith.constant 0 : i32
    %c0_i32_0 = arith.constant 0 : i32
    %c0_i32_1 = arith.constant 0 : i32
    return %arg0, %c0_i32, %c0_i32_0 : i32, i32, i32
  }
}

</mosaic_0001>

<bundles_post_ra>
// kernel: tpu_custom_call.1
= control target key start
LH: loop header
LB: loop body
LE: loop exit
PB: predicated region body
PF: predicated region fallthrough
CT: control target
= control target key end

     0   :  { %8 = vsyncpa [#allocation3], 0  ;;  %s2097_s0 = inlined_call_operand.vmem [shape: bf16[2,4,326], index: 0, kind: input, shape index: {}]   ;;  %s2098_s1 = inlined_call_operand.vmem [shape: bf16[9,16,4], index: 1, kind: input, shape index: {}]   ;;  %s2099_s2 = inlined_call_operand.vmem [shape: f32[16,1], index: 2, kind: input, shape index: {}]   ;;  %s2100_s3 = inlined_call_operand.hbm [shape: f32[2,8,288], index: 3, kind: output, shape index: {}]  }
   0x1   :  { %10 = vsyncpa [#allocation3 + $0x1], 0  ;;  %s1825_s12 = smov 0   ;;  %s1827_s13 = smov 0  }
   0x2   :  { %s1829_s14 = smov 0   ;;  %s1831_s15 = smov 0  }
   0x3 LB: > { %s1846_s16 = sadd.s32 4294967295, %s1790_s15   ;;  %s1479_s17 = sadd.s32 4294967294, %s1790_s15   ;;  %s1790_s15 = sphi %s1831_s15, %s2106_s15   ;;  %s1786_s14 = sphi %s1829_s14, %s2105_s14   ;;  %s1782_s13 = sphi %s1827_s13, %s2104_s13   ;;  %s1778_s12 = sphi %s1825_s12, %s2103_s12  }
   0x4   : > { %s1850_s18 = sadd.s32 1, %s1790_s15   ;;  %s91_s19 = sadd.s32 1, %s1786_s14 }
   0x5   : > { %s88_s20 = ssub.s32 %s1790_s15, %s1850_s18  ;;  %p101_p0 = scmp.ne.s32.totalorder %s1786_s14, %s1782_s13 }
   0x6   : > { %p89_p1 = scmp.eq.s32.totalorder %s88_s20, 0  ;;  %p102_p2 = scmp.eq.s32.totalorder %s1846_s16, 1 }
   0x7   : > { %p107_p3 = scmp.ne.s32.totalorder %s1782_s13, %s1778_s12  ;;  %p108_p4 = scmp.eq.s32.totalorder %s1479_s17, 1 }
   0x8   : > { %s1861_s21 = scalar_select %p89_p1, %s1786_s14, %s91_s19  }
   0x9   : > { %p1863_p5 = por %p102_p2, %p101_p0  ;;  %p1867_p6 = por %p108_p4, %p107_p3 }
   0xa   : > { %p1482_p7 = scmp.ge.s32.totalorder %s1790_s15, 1  ;;  %p140_p8 = scmp.lt.s32.totalorder %s1790_s15, 3 }
   0xc   : > { %p141_p9 = pnand %p1482_p7, %p140_p8 }
   0xd   : > { %p164_p10 = scmp.lt.s32.totalorder (!%p141_p9), %s1846_s16, 1  ;;  %v186_v0 = vlaneseq (!%p141_p9)  ;;  %v1792_v1 = vmov (!%p141_p9), 1983009808   ;;  %v1793_v3 = vmov (!%p141_p9), 0.0   ;;  %vm1794_vm0 = vmmov (!%p141_p9), 0   ;;  %s1796_s29 = smov (!%p141_p9), 127  }
   0xe   : > { %144 = sbr.rel (%p141_p9) target bundleno = 510 (0x1fe), region = 32  ;;  %v184_v2 = vunpack.c.l.s4 (!%p141_p9), %v1792_v1  ;;  %1557 = vmatprep.subr.bf16.mxu1 (!%p141_p9), %v1793_v3  ;;  %1559 = vmatprep.mubr.msk.bf16.mxu1 (!%p141_p9), %vm1794_vm0, %v1793_v3  ;;  %v1795_v6 = vmov (!%p141_p9), 0   ;;  %s1797_s30 = smov (!%p141_p9), 126   ;;  %v1365_v48 = vld [vmem:[%s2099_s2] sm:$0xff] (!%p141_p9)  ;;  %v1366_v49 = vld [vmem:[%s2099_s2 + $0x8] sm:$0xff] (!%p141_p9)  ;;  %vm211_vm1 = vcmask (!%p141_p9), 1041408  }
   0xf   : > { %v187_v4 = vshrl.u32 (!%p141_p9), %v186_v0, 7  ;;  %253 = vmatprep.mubr.bf16.mxu0 (!%p141_p9), %v1795_v6  ;;  %1698 = vset.pattern.permute.xlu1 (!%p141_p9), %v1795_v6  ;;  %s1798_s4 = smov (!%p141_p9), 110   ;;  %s1799_s5 = smov (!%p141_p9), 109   ;;  %vm204_vm2 = vcmask (!%p141_p9), 1039360   ;;  %v1707_v53 = vld [vmem:[%s2098_s1 + $0x8] sm:$0xff] (!%p141_p9)   ;;  %vm207_vm3 = vcmask (!%p141_p9), 31744  }
  0x10   : > { %v185_v5 = vunpack.c.0.s8 (!%p141_p9), %v184_v2  ;;  %1697 = vset.pattern.permute.xlu0 (!%p141_p9), %v1795_v6  ;;  %s1800_s6 = smov (!%p141_p9), 108   ;;  %s1801_s7 = smov (!%p141_p9), 92   ;;  %vm438_vm4 = vcmask (!%p141_p9), 1031168   ;;  %v1708_v63 = vld [vmem:[%s2098_s1] sm:$0xff] (!%p141_p9)   ;;  %vm575_vm5 = vcmask (!%p141_p9), 900096   ;;  %vm712_vm6 = vcmask (!%p141_p9), 891904  }
  0x11   : > { %s1802_s8 = smov (!%p141_p9), 91   ;;  %s1803_s9 = smov (!%p141_p9), 90   ;;  %vm849_vm7 = vcmask (!%p141_p9), 883712   ;;  %vm986_vm8 = vcmask (!%p141_p9), 752640   ;;  %vm1123_vm9 = vcmask (!%p141_p9), 744448   ;;  %vm1260_vm10 = vcmask (!%p141_p9), 736256  }
  0x12   : > { %v1880_v7 = vsub.s32 (!%p141_p9), %v185_v5, %v187_v4  ;;  %s161_s20 = sand.u32 (!%p141_p9), 1, %s1782_s13   ;;  %vm1403_vm11 = vcmask (!%p141_p9), 261120   ;;  %s1645_s26 = smul.u32 (!%p141_p9), 384, %s1846_s16 }
  0x15   : > { %s165_s24 = scalar_select %p164_p10, %s1846_s16, 1 }
  0x16   : > { %s1406_s16 = scalar_lea.sflag [#allocation3], %s161_s20 }
  0x17   : > { %s1644_s25 = smul.u32 6, %s165_s24 }
  0x18   : > { %s1643_s24 = smul.u32 24, %s161_s20 }
  0x19   : > { %s1886_s28 = scalar_lea.vmem %s2097_s0, %s1644_s25 }
  0x1a   : > { %v170_v8 = vld [vmem:[%s1886_s28] sm:$0x3f]  ;;  %s163_s25 = scalar_lea.vmem [#allocation2], %s1643_s24 }
  0x1b   : > { %v1890_v9 = vrot.slane %v170_v8, %v1880_v7  ;;  %v182_v10 = vcombine.high %v170_v8, %v170_v8  ;;  %v406_v11 = vld [vmem:[%s1886_s28] sm:$0x3f]  ;;  %v1709_v8 = vld [vmem:[%s2098_s1 + $0x10] sm:$0xff]   ;;  %s1420_s27 = sshll.u32 %s163_s25, 4  ;;  %s2055_s27 = int_to_ptr.vmem [resolvable:$true] %s1420_s27 }
  0x1c   : > { %v423_v14 = vrot.slane %v406_v11, %v1880_v7  ;;  %v416_v15 = vcombine.high %v406_v11, %v406_v11  ;;  %v543_v17 = vld [vmem:[%s1886_s28] sm:$0x3f] }
  0x1d   : > { %198 = vrot.lane.b32.xlu0 %v1890_v9, %s1796_s29  ;;  %v1895_v12 = vrot.slane %v182_v10, %v1880_v7  ;;  %v1899_v13 = vcombine.high %v1890_v9, %v1890_v9  ;;  %v560_v19 = vrot.slane %v543_v17, %v1880_v7  ;;  %v553_v20 = vcombine.high %v543_v17, %v543_v17  ;;  %v680_v22 = vld [vmem:[%s1886_s28] sm:$0x3f] }
  0x1e   : > { %v431_v16 = vcombine.high %v423_v14, %v423_v14  ;;  %v430_v18 = vrot.slane %v416_v15, %v1880_v7  ;;  %v697_v24 = vrot.slane %v680_v22, %v1880_v7  ;;  %v690_v25 = vcombine.high %v680_v22, %v680_v22  ;;  %v817_v27 = vld [vmem:[%s1886_s28] sm:$0x3f]  ;;  %v1710_v15 = vld [vmem:[%s2098_s1 + $0x18] sm:$0xff]  }
  0x1f   : > { %202 = vrot.lane.b32.xlu1 %v1895_v12, %s1796_s29  ;;  %v568_v21 = vcombine.high %v560_v19, %v560_v19  ;;  %v567_v23 = vrot.slane %v553_v20, %v1880_v7  ;;  %v834_v29 = vrot.slane %v817_v27, %v1880_v7  ;;  %v827_v30 = vcombine.high %v817_v27, %v817_v27  ;;  %v954_v32 = vld [vmem:[%s1886_s28] sm:$0x3f] }
  0x20   : > { %v705_v26 = vcombine.high %v697_v24, %v697_v24  ;;  %v704_v28 = vrot.slane %v690_v25, %v1880_v7  ;;  %v971_v34 = vrot.slane %v954_v32, %v1880_v7  ;;  %v964_v35 = vcombine.high %v954_v32, %v954_v32  ;;  %v1091_v37 = vld [vmem:[%s1886_s28] sm:$0x3f] }
  0x21   : > { %200 = vrot.lane.b32.xlu0 %v1899_v13, %s1796_s29  ;;  %v842_v31 = vcombine.high %v834_v29, %v834_v29  ;;  %v841_v33 = vrot.slane %v827_v30, %v1880_v7  ;;  %v1108_v39 = vrot.slane %v1091_v37, %v1880_v7  ;;  %v1101_v40 = vcombine.high %v1091_v37, %v1091_v37  ;;  %v1228_v42 = vld [vmem:[%s1886_s28] sm:$0x3f] }
  0x22   : > { %v979_v36 = vcombine.high %v971_v34, %v971_v34  ;;  %v978_v38 = vrot.slane %v964_v35, %v1880_v7  ;;  %v1245_v44 = vrot.slane %v1228_v42, %v1880_v7  ;;  %v1238_v45 = vcombine.high %v1228_v42, %v1228_v42 }
  0x23   : > { %432 = vrot.lane.b32.xlu1 %v423_v14, %s1797_s30  ;;  %v1116_v41 = vcombine.high %v1108_v39, %v1108_v39  ;;  %v1115_v43 = vrot.slane %v1101_v40, %v1880_v7  ;;  %v320_v57 = vsel %vm211_vm1, %v1895_v12, 0  ;;  %v314_v60 = vsel %vm211_vm1, %v1890_v9, 0 }
  0x24   : > { %v1253_v46 = vcombine.high %v1245_v44, %v1245_v44  ;;  %v1252_v47 = vrot.slane %v1238_v45, %v1880_v7 }
  0x25   : > { %434 = vrot.lane.b32.xlu0 %v431_v16, %s1797_s30 }
  0x27   : > { %436 = vrot.lane.b32.xlu1 %v430_v18, %s1797_s30  ;;  %s2053_s30 = scalar_lea.hbm %s2100_s3, %s1645_s26 }
  0x29   : > { %569 = vrot.lane.b32.xlu0 %v560_v19, %s1798_s4 }
  0x2b   : > { %571 = vrot.lane.b32.xlu1 %v568_v21, %s1798_s4 }
  0x2d   : > { %573 = vrot.lane.b32.xlu0 %v567_v23, %s1798_s4  ;;  %v1711_v23 = vld [vmem:[%s2098_s1 + $0x20] sm:$0xff]   ;;  %s1728_s4 = scalar_lea.vmem %s2055_s27, 384 }
  0x2e   : > { %p1729_p11 = scmp.ne.s32.totalorder %s2055_s27, %s1728_s4 }
  0x2f   : > { %706 = vrot.lane.b32.xlu1 %v697_v24, %s1799_s5 }
  0x30   : > { %p1730_p12 = pnand %p1729_p11, %p1863_p5 }
  0x31   : > { %708 = vrot.lane.b32.xlu0 %v705_v26, %s1799_s5 }
  0x32   : > { %p1731_p13 = pneg %p1730_p12 }
  0x33   : > { %710 = vrot.lane.b32.xlu1 %v704_v28, %s1799_s5  ;;  %s1804_s5 = smov [#allocation2]  }
  0x35   : > { %843 = vrot.lane.b32.xlu0 %v834_v29, %s1800_s6  ;;  %v1712_v29 = vld [vmem:[%s2098_s1 + $0x28] sm:$0xff]  }
  0x37   : > { %845 = vrot.lane.b32.xlu1 %v842_v31, %s1800_s6 }
  0x39   : > { %847 = vrot.lane.b32.xlu0 %v841_v33, %s1800_s6  ;;  %s1732_s6 = sshll.u32 %s1804_s5, 4  ;;  %s1733_s6 = int_to_ptr.vmem [resolvable:$false] %s1732_s6 }
  0x3a   : > { %p1735_p0 = scmp.lt.s32.totalorder %s2055_s27, %s1733_s6 }
  0x3b   : > { %980 = vrot.lane.b32.xlu1 %v971_v34, %s1801_s7 }
  0x3d   : > { %982 = vrot.lane.b32.xlu0 %v979_v36, %s1801_s7  ;;  %v1713_v36 = vld [vmem:[%s2098_s1 + $0x30] sm:$0xff]  }
  0x3f   : > { %984 = vrot.lane.b32.xlu1 %v978_v38, %s1801_s7  ;;  %s1734_s7 = scalar_lea.vmem %s1733_s6, 768 }
  0x40   : > { %p1736_p1 = scmp.lt.s32.totalorder %s1734_s7, %s1728_s4 }
  0x41   : > { %1117 = vrot.lane.b32.xlu0 %v1108_v39, %s1802_s8 }
  0x42   : > { %p1737_p2 = por %p1736_p1, %p1735_p0 }
  0x43   : > { %1119 = vrot.lane.b32.xlu1 %v1116_v41, %s1802_s8 }
  0x44   : > { %p1738_p3 = pnand %p1737_p2, %p1731_p13 }
  0x45   : > { %1121 = vrot.lane.b32.xlu0 %v1115_v43, %s1802_s8  ;;  %v1714_v43 = vld [vmem:[%s2098_s1 + $0x38] sm:$0xff]  }
  0x47   : > { %1254 = vrot.lane.b32.xlu1 %v1245_v44, %s1803_s9 }
  0x49   : > { %1256 = vrot.lane.b32.xlu0 %v1253_v46, %s1803_s9  ;;  %v1715_v46 = vld [vmem:[%s2098_s1 + $0x40] sm:$0xff]  }
  0x4b   : > { %1258 = vrot.lane.b32.xlu1 %v1252_v47, %s1803_s9 }
  0x4d   : > { %1374 = vperm.xlu0 %1697, %v1366_v49  }
  0x4f   : > { %1369 = vperm.xlu1 %1698, %v1365_v48  }
  0x8f   : > { %v199_v50 = vpop.permute.xlu0 %198 }
  0x91   : > { %v203_v51 = vpop.permute.xlu1 %202 }
  0x92   : > { %v219_v52 = vsel %vm211_vm1, %v203_v51, 0 }
  0x93   : > { %v201_v54 = vpop.permute.xlu0 %200  ;;  %1558 = vmatpush3.bf16.msra.mxu1 %v219_v52 }
  0x94   : > { %v206_v55 = vsel %vm204_vm2, %v201_v54, %v203_v51  ;;  %v205_v56 = vsel %vm204_vm2, %v199_v50, %v201_v54  ;;  %1563 = vmatprep.subr.bf16.mxu1 %v1793_v3 }
  0x95   : > { %1487 = vmatprep.subr.msk.bf16.mxu0 %vm211_vm1, %v206_v55  ;;  %v213_v58 = vsel %vm211_vm1, %v205_v56, 0  ;;  %v433_v59 = vpop.permute.xlu1 %432 }
  0x96   : > { %222 = vmatpush1.bf16.msra.mxu0 %v213_v58  ;;  %1560 = vmatmul.mubr.msk.bf16.vlgmr.msra.gmra.mrb[0].mxu1 %vm207_vm3, %v1707_v53 }
  0x97   : > { %1491 = vmatprep.subr.msk.bf16.mxu0 %vm211_vm1, %v1899_v13  ;;  %1564 = vmatpush3.bf16.msra.mxu1 %v320_v57  ;;  %v435_v61 = vpop.permute.xlu0 %434 }
  0x98   : > { %1565 = vmatprep.mubr.msk.bf16.mxu1 %vm1794_vm0, %v1793_v3  ;;  %1569 = vmatprep.subr.bf16.mxu1 %v1793_v3  ;;  %v439_v5 = vsel %vm438_vm4, %v433_v59, %v435_v61 }
  0x99   : > { %1488 = vmatmul.mubr.msk.bf16.vlgmr.msra.gmra.mrb[0].mxu0 %vm207_vm3, %v1707_v53  ;;  %v437_v62 = vpop.permute.xlu1 %436  ;;  %v445_v9 = vsel %vm211_vm1, %v439_v5, 0 }
  0x9a   : > { %323 = vmatpush1.bf16.msra.mxu0 %v314_v60  ;;  %v440_v0 = vsel %vm438_vm4, %v435_v61, %v437_v62  ;;  %354 = vmatprep.mubr.bf16.mxu0 %v1795_v6  ;;  %v451_v2 = vsel %vm211_vm1, %v437_v62, 0 }
  0x9b   : > { %1497 = vmatprep.subr.msk.bf16.mxu0 %vm211_vm1, %v440_v0  ;;  %v570_v1 = vpop.permute.xlu0 %569 }
  0x9d   : > { %v572_v4 = vpop.permute.xlu1 %571 }
  0x9e   : > { %1566 = vmatmul.mubr.msk.bf16.vlgmr.msra.gmra.mrb[4].mxu1 %vm207_vm3, %v1708_v63  ;;  %v576_v17 = vsel %vm575_vm5, %v570_v1, %v572_v4 }
  0x9f   : > { %1570 = vmatpush3.bf16.msra.mxu1 %v451_v2  ;;  %1571 = vmatprep.mubr.msk.bf16.mxu1 %vm1794_vm0, %v1793_v3  ;;  %v574_v7 = vpop.permute.xlu0 %573  ;;  %v582_v20 = vsel %vm211_vm1, %v576_v17, 0 }
  0xa0   : > { %1575 = vmatprep.subr.bf16.mxu1 %v1793_v3  ;;  %v588_v11 = vsel %vm211_vm1, %v574_v7, 0  ;;  %v577_v12 = vsel %vm575_vm5, %v572_v4, %v574_v7 }
  0xa1   : > { %v707_v10 = vpop.permute.xlu1 %706 }
  0xa3   : > { %v709_v13 = vpop.permute.xlu0 %708 }
  0xa4   : > { %v713_v27 = vsel %vm712_vm6, %v707_v10, %v709_v13 }
  0xa5   : > { %1492 = vmatmul.mubr.msk.bf16.vlgmr.msra.gmra.mrb[0].mxu0 %vm207_vm3, %v1708_v63  ;;  %v711_v14 = vpop.permute.xlu1 %710  ;;  %v719_v30 = vsel %vm211_vm1, %v713_v27, 0 }
  0xa6   : > { %454 = vmatpush1.bf16.msra.mxu0 %v445_v9  ;;  %1572 = vmatmul.mubr.msk.bf16.vlgmr.msra.gmra.mrb[8].mxu1 %vm207_vm3, %v1709_v8  ;;  %v725_v18 = vsel %vm211_vm1, %v711_v14, 0  ;;  %v714_v21 = vsel %vm712_vm6, %v709_v13, %v711_v14 }
  0xa7   : > { %1576 = vmatpush3.bf16.msra.mxu1 %v588_v11  ;;  %1577 = vmatprep.mubr.msk.bf16.mxu1 %vm1794_vm0, %v1793_v3  ;;  %v844_v16 = vpop.permute.xlu0 %843 }
  0xa8   : > { %485 = vmatprep.mubr.bf16.mxu0 %v1795_v6  ;;  %1503 = vmatprep.subr.msk.bf16.mxu0 %vm211_vm1, %v577_v12 }
  0xa9   : > { %1581 = vmatprep.subr.bf16.mxu1 %v1793_v3  ;;  %v846_v19 = vpop.permute.xlu1 %845 }
  0xaa   : > { %v850_v38 = vsel %vm849_vm7, %v844_v16, %v846_v19 }
  0xab   : > { %v848_v22 = vpop.permute.xlu0 %847  ;;  %v856_v40 = vsel %vm211_vm1, %v850_v38, 0 }
  0xac   : > { %v862_v25 = vsel %vm211_vm1, %v848_v22, 0  ;;  %v851_v33 = vsel %vm849_vm7, %v846_v19, %v848_v22 }
  0xad   : > { %v981_v24 = vpop.permute.xlu1 %980 }
  0xae   : > { %1578 = vmatmul.mubr.msk.bf16.vlgmr.msra.gmra.mrb[12].mxu1 %vm207_vm3, %v1710_v15 }
  0xaf   : > { %1582 = vmatpush3.bf16.msra.mxu1 %v725_v18  ;;  %1583 = vmatprep.mubr.msk.bf16.mxu1 %vm1794_vm0, %v1793_v3  ;;  %v983_v26 = vpop.permute.xlu0 %982 }
  0xb0   : > { %1587 = vmatprep.subr.bf16.mxu1 %v1793_v3  ;;  %v987_v45 = vsel %vm986_vm8, %v981_v24, %v983_v26 }
  0xb1   : > { %1498 = vmatmul.mubr.msk.bf16.vlgmr.msra.gmra.mrb[0].mxu0 %vm207_vm3, %v1709_v8  ;;  %v985_v28 = vpop.permute.xlu1 %984  ;;  %v993_v47 = vsel %vm211_vm1, %v987_v45, 0 }
  0xb2   : > { %591 = vmatpush1.bf16.msra.mxu0 %v582_v20  ;;  %622 = vmatprep.mubr.bf16.mxu0 %v1795_v6  ;;  %v999_v32 = vsel %vm211_vm1, %v985_v28, 0  ;;  %v988_v41 = vsel %vm986_vm8, %v983_v26, %v985_v28 }
  0xb3   : > { %1509 = vmatprep.subr.msk.bf16.mxu0 %vm211_vm1, %v714_v21  ;;  %v1118_v31 = vpop.permute.xlu0 %1117 }
  0xb5   : > { %v1120_v34 = vpop.permute.xlu1 %1119 }
  0xb6   : > { %1584 = vmatmul.mubr.msk.bf16.vlgmr.msra.gmra.mrb[16].mxu1 %vm207_vm3, %v1711_v23 }
  0xb7   : > { %1588 = vmatpush3.bf16.msra.mxu1 %v862_v25  ;;  %1589 = vmatprep.mubr.msk.bf16.mxu1 %vm1794_vm0, %v1793_v3  ;;  %v1122_v35 = vpop.permute.xlu0 %1121 }
  0xb8   : > { %1593 = vmatprep.subr.bf16.mxu1 %v1793_v3  ;;  %v1136_v39 = vsel %vm211_vm1, %v1122_v35, 0  ;;  %v1125_v48 = vsel %vm1123_vm9, %v1120_v34, %v1122_v35 }
  0xb9   : > { %v1255_v37 = vpop.permute.xlu1 %1254 }
  0xbb   : > { %v1257_v49 = vpop.permute.xlu0 %1256 }
  0xbc   : > { %v1261_v52 = vsel %vm1260_vm10, %v1255_v37, %v1257_v49 }
  0xbd   : > { %1504 = vmatmul.mubr.msk.bf16.vlgmr.msra.gmra.mrb[0].mxu0 %vm207_vm3, %v1710_v15  ;;  %v1259_v42 = vpop.permute.xlu1 %1258  ;;  %v1267_v53 = vsel %vm211_vm1, %v1261_v52, 0 }
  0xbe   : > { %728 = vmatpush1.bf16.msra.mxu0 %v719_v30  ;;  %1590 = vmatmul.mubr.msk.bf16.vlgmr.msra.gmra.mrb[20].mxu1 %vm207_vm3, %v1712_v29  ;;  %v1273_v44 = vsel %vm211_vm1, %v1259_v42, 0  ;;  %v1262_v51 = vsel %vm1260_vm10, %v1257_v49, %v1259_v42 }
  0xbf   : > { %1594 = vmatpush3.bf16.msra.mxu1 %v999_v32  ;;  %1595 = vmatprep.mubr.msk.bf16.mxu1 %vm1794_vm0, %v1793_v3 }
  0xc0   : > { %759 = vmatprep.mubr.bf16.mxu0 %v1795_v6  ;;  %1515 = vmatprep.subr.msk.bf16.mxu0 %vm211_vm1, %v851_v33 }
  0xc1   : > { %1599 = vmatprep.subr.bf16.mxu1 %v1793_v3 }
  0xc6   : > { %1596 = vmatmul.mubr.msk.bf16.vlgmr.msra.gmra.mrb[24].mxu1 %vm207_vm3, %v1713_v36 }
  0xc7   : > { %1600 = vmatpush3.bf16.msra.mxu1 %v1136_v39  ;;  %1601 = vmatprep.mubr.msk.bf16.mxu1 %vm1794_vm0, %v1793_v3 }
  0xc8   : > { %1605 = vmatprep.subr.bf16.mxu1 %v1793_v3 }
  0xc9   : > { %1510 = vmatmul.mubr.msk.bf16.vlgmr.msra.gmra.mrb[0].mxu0 %vm207_vm3, %v1711_v23 }
  0xca   : > { %865 = vmatpush1.bf16.msra.mxu0 %v856_v40  ;;  %896 = vmatprep.mubr.bf16.mxu0 %v1795_v6 }
  0xcb   : > { %1521 = vmatprep.subr.msk.bf16.mxu0 %vm211_vm1, %v988_v41 }
  0xcc   : > { %v1375_v41 = vpop.permute.xlu0 %1374 }
  0xce   : > { %1602 = vmatmul.mubr.msk.bf16.vlgmr.msra.gmra.mrb[28].mxu1 %vm207_vm3, %v1714_v43 }
  0xcf   : > { %1606 = vmatpush3.bf16.msra.mxu1 %v1273_v44  ;;  %1607 = vmatprep.mubr.msk.bf16.mxu1 %vm1794_vm0, %v1793_v3  ;;  %v1124_v3 = vsel %vm1123_vm9, %v1118_v31, %v1120_v34 }
  0xd0   : > { %v1130_v50 = vsel %vm211_vm1, %v1124_v3, 0  ;;  %v1370_v3 = vpop.permute.xlu1 %1369 }
  0xd5   : > { %1516 = vmatmul.mubr.msk.bf16.vlgmr.msra.gmra.mrb[0].mxu0 %vm207_vm3, %v1712_v29 }
  0xd6   : > { %1002 = vmatpush1.bf16.msra.mxu0 %v993_v47  ;;  %1608 = vmatmul.mubr.msk.bf16.vlgmr.msra.gmra.mrb[32].mxu1 %vm207_vm3, %v1715_v46 }
  0xd7   : > { %1033 = vmatprep.mubr.bf16.mxu0 %v1795_v6  ;;  %1527 = vmatprep.subr.msk.bf16.mxu0 %vm211_vm1, %v1125_v48 }
  0xe1   : > { %1522 = vmatmul.mubr.msk.bf16.vlgmr.msra.gmra.mrb[0].mxu0 %vm207_vm3, %v1713_v36 }
  0xe2   : > { %1139 = vmatpush1.bf16.msra.mxu0 %v1130_v50  ;;  %1170 = vmatprep.mubr.bf16.mxu0 %v1795_v6 }
  0xe3   : > { %1533 = vmatprep.subr.msk.bf16.mxu0 %vm211_vm1, %v1262_v51 }
  0xed   : > { %1528 = vmatmul.mubr.msk.bf16.vlgmr.msra.gmra.mrb[0].mxu0 %vm207_vm3, %v1714_v43 }
  0xee   : > { %1276 = vmatpush1.bf16.msra.mxu0 %v1267_v53  ;;  %1307 = vmatprep.mubr.bf16.mxu0 %v1795_v6 }
  0xf9   : > { %1534 = vmatmul.mubr.msk.bf16.vlgmr.msra.gmra.mrb[0].mxu0 %vm207_vm3, %v1715_v46 }
 0x169   : > { %v298_v54 = vpop.f32.mrb[0].mxu1 }
 0x16a   : > { %v1561_v55 = vpop.f32.mrb[1].mxu1 }
 0x16b   : > { %v301_v56 = vpop.f32.mrb[2].mxu1 }
 0x16c   : > { %v1562_v57 = vpop.f32.mrb[3].mxu1 }
 0x171   : > { %v399_v58 = vpop.f32.mrb[4].mxu1 }
 0x172   : > { %v400_v59 = vadd.f32 %v399_v58, %v298_v54  ;;  %v1567_v60 = vpop.f32.mrb[5].mxu1 }
 0x173   : > { %v402_v61 = vpop.f32.mrb[6].mxu1 }
 0x174   : > { %v403_v62 = vadd.f32 %v402_v61, %v301_v56  ;;  %v1568_v63 = vpop.f32.mrb[7].mxu1 }
 0x179   : > { %v530_v0 = vpop.f32.mrb[8].mxu1 }
 0x17a   : > { %v539_v1 = vadd.f32 %v530_v0, %v400_v59  ;;  %v1573_v2 = vpop.f32.mrb[9].mxu1 }
 0x17b   : > { %v533_v4 = vpop.f32.mrb[10].mxu1 }
 0x17c   : > { %v542_v5 = vadd.f32 %v533_v4, %v403_v62  ;;  %v1574_v7 = vpop.f32.mrb[11].mxu1 }
 0x181   : > { %v667_v8 = vpop.f32.mrb[12].mxu1 }
 0x182   : > { %v676_v6 = vadd.f32 %v667_v8, %v539_v1  ;;  %v1579_v9 = vpop.f32.mrb[13].mxu1 }
 0x183   : > { %v670_v10 = vpop.f32.mrb[14].mxu1 }
 0x184   : > { %v679_v11 = vadd.f32 %v670_v10, %v542_v5  ;;  %v1580_v12 = vpop.f32.mrb[15].mxu1 }
 0x189   : > { %v804_v13 = vpop.f32.mrb[16].mxu1 }
 0x18a   : > { %v813_v14 = vadd.f32 %v804_v13, %v676_v6  ;;  %v1585_v15 = vpop.f32.mrb[17].mxu1 }
 0x18b   : > { %v807_v16 = vpop.f32.mrb[18].mxu1 }
 0x18c   : > { %v816_v17 = vadd.f32 %v807_v16, %v679_v11  ;;  %v1586_v18 = vpop.f32.mrb[19].mxu1 }
 0x191   : > { %v941_v19 = vpop.f32.mrb[20].mxu1 }
 0x192   : > { %v950_v20 = vadd.f32 %v941_v19, %v813_v14  ;;  %v1591_v21 = vpop.f32.mrb[21].mxu1 }
 0x193   : > { %v944_v22 = vpop.f32.mrb[22].mxu1 }
 0x194   : > { %v953_v23 = vadd.f32 %v944_v22, %v816_v17  ;;  %v1592_v24 = vpop.f32.mrb[23].mxu1 }
 0x199   : > { %v1078_v25 = vpop.f32.mrb[24].mxu1 }
 0x19a   : > { %v1087_v26 = vadd.f32 %v1078_v25, %v950_v20  ;;  %v1597_v27 = vpop.f32.mrb[25].mxu1 }
 0x19b   : > { %v1081_v28 = vpop.f32.mrb[26].mxu1 }
 0x19c   : > { %v1090_v29 = vadd.f32 %v1081_v28, %v953_v23  ;;  %v1598_v30 = vpop.f32.mrb[27].mxu1 }
 0x1a1   : > { %v1215_v31 = vpop.f32.mrb[28].mxu1 }
 0x1a2   : > { %v1224_v32 = vadd.f32 %v1215_v31, %v1087_v26  ;;  %v1603_v33 = vpop.f32.mrb[29].mxu1 }
 0x1a3   : > { %v1218_v34 = vpop.f32.mrb[30].mxu1 }
 0x1a4   : > { %v1227_v35 = vadd.f32 %v1218_v34, %v1090_v29  ;;  %v1604_v36 = vpop.f32.mrb[31].mxu1 }
 0x1a9   : > { %v1352_v37 = vpop.f32.mrb[32].mxu1 }
 0x1aa   : > { %v1361_v38 = vadd.f32 %v1352_v37, %v1224_v32  ;;  %v1609_v39 = vpop.f32.mrb[33].mxu1 }
 0x1ab   : > { %v1355_v40 = vpop.f32.mrb[34].mxu1 }
 0x1ac   : > { %v1364_v42 = vadd.f32 %v1355_v40, %v1227_v35  ;;  %v1610_v43 = vpop.f32.mrb[35].mxu1  ;;  %v1379_v49 = vadd.f32 %v1370_v3, %v1361_v38 }
 0x1ae   : > { %v1382_v44 = vadd.f32 %v1375_v41, %v1364_v42 }
 0x1b0   : > { %v1385_v45 = vsub.f32 0.0, %v1382_v44 }
 0x1b2   : > { %v1390_v46 = vmul.f32 1.442695, %v1385_v45 }
 0x1b4   : > { %1716 = vpow2.f32 %v1390_v46 }
 0x1be   : > { %v1717_v47 = vpop.eup %1716 }
 0x1bf   : > { %v1394_v48 = vadd.f32 1.0, %v1717_v47 }
 0x1c1   : > { %1718 = vrcp.f32 %v1394_v48 }
 0x1cb   : > { %v1719_v50 = vpop.eup %1718 }
 0x1cc   : > { %v1309_v51 = vpop.f32.mrb[0].mxu0  ;;  %v1400_v52 = vmul.f32 %v1719_v50, %v1379_v49 }
 0x1cd   : > { %v1311_v53 = vpop.f32.mrb[1].mxu0  ;;  %v1377_v2 = vadd.f32 %v1370_v3, %v1309_v51 }
 0x1ce   : > { %v1313_v54 = vpop.f32.mrb[2].mxu0  ;;  %1404 = vst.msk [vmem:[%s163_s25 + $0x10] sm:$0xff] %vm1403_vm11, %v1400_v52  ;;  %v1378_v5 = vadd.f32 %v1370_v3, %v1311_v53 }
 0x1cf   : > { %v1380_v55 = vadd.f32 %v1375_v41, %v1313_v54  ;;  %v1315_v56 = vpop.f32.mrb[3].mxu0 }
 0x1d0   : > { %v1381_v57 = vadd.f32 %v1375_v41, %v1315_v56 }
 0x1d1   : > { %v1383_v58 = vsub.f32 0.0, %v1380_v55 }
 0x1d2   : > { %v1384_v59 = vsub.f32 0.0, %v1381_v57 }
 0x1d3   : > { %v1386_v60 = vmul.f32 1.442695, %v1383_v58 }
 0x1d4   : > { %v1388_v61 = vmul.f32 1.442695, %v1384_v59 }
 0x1d5   : > { %1720 = vpow2.f32 %v1386_v60 }
 0x1d6   : > { %1722 = vpow2.f32 %v1388_v61 }
 0x1df   : > { %v1721_v62 = vpop.eup %1720 }
 0x1e0   : > { %v1723_v63 = vpop.eup %1722  ;;  %v1392_v0 = vadd.f32 1.0, %v1721_v62 }
 0x1e1   : > { %v1393_v1 = vadd.f32 1.0, %v1723_v63 }
 0x1e2   : > { %1724 = vrcp.f32 %v1392_v0 }
 0x1e3   : > { %1726 = vrcp.f32 %v1393_v1 }
 0x1ec   : > { %v1725_v4 = vpop.eup %1724 }
 0x1ed   : > { %v1727_v7 = vpop.eup %1726  ;;  %v1398_v8 = vmul.f32 %v1725_v4, %v1377_v2 }
 0x1ee   : > { %v1399_v6 = vmul.f32 %v1727_v7, %v1378_v5 }
 0x1ef   : > { %1401 = vst [vmem:[%s163_s25] sm:$0xff] %v1398_v8 }
 0x1f0   : > { %1402 = vst [vmem:[%s163_s25 + $0x8] sm:$0xff] %v1399_v6 }
 0x1f1   : > { %1741 = shalt.err (!%p1738_p3)
}
 0x1f2   : > { %s1742_s8 = scalar_lea.hbm %s2053_s30, 384  ;;  %s1746_s11 = scalar_lea.hbm %s2100_s3, 768 }
 0x1f3   : > { %p1743_p4 = scmp.ne.s32.totalorder %s2053_s30, %s1742_s8  ;;  %p1747_p9 = scmp.lt.u32.totalorder %s2053_s30, %s2100_s3 }
 0x1f4   : > { %p1748_p10 = scmp.lt.u32.totalorder %s1746_s11, %s1742_s8  ;;  %p1750_p12 = scmp.lt.u32.totalorder %s1742_s8, %s2053_s30 }
 0x1f5   : > { %p1744_p7 = pnand %p1743_p4, %p1863_p5 }
 0x1f6   : > { %p1749_p11 = por %p1748_p10, %p1747_p9 }
 0x1f7   : > { %p1745_p8 = pneg %p1744_p7 }
 0x1f8   : > { %p1751_p13 = por %p1750_p12, %p1749_p11 }
 0x1fa   : > { %p1752_p0 = pnand %p1751_p13, %p1745_p8 }
 0x1fc   : > { %1755 = shalt.err (!%p1752_p0)
}
 0x1fd   : > { %1646 = dma.vmem_to_hbm [thread:$0]  (%p1863_p5), %s2055_s27, 384, %s2053_s30, %s1406_s16  }
 0x1fe PF: > { %p1652_p1 = scmp.ge.s32.totalorder %s1790_s15, 2  ;;  %s1432_s20 = sand.u32 1, %s1778_s12  }
 0x1ff   : > { %s1433_s24 = scalar_lea.sflag [#allocation3], %s1432_s20 }
 0x200   : > { %p1649_p2 = pnand %p1652_p1, %p1867_p6 }
 0x202   : > { %1773 = dma.done.wait (!%p1649_p2), %s1433_s24, 384  }
 0x203   : > { %1775 = vsyncadd (!%p1649_p2), %s1433_s24, 4294966912  ;;  %p13_p3 = scmp.ge.s32.totalorder %s1850_s18, 4   ;;  %s2103_s12 = smov %s1782_s13 }
 0x204   : > { %s2104_s13 = smov %s1786_s14  ;;  %s2105_s14 = smov %s1861_s21 }
 0x205   : > { %s2106_s15 = smov %s1850_s18  ;;  %15 = sbr.rel (!%p13_p3) target bundleno = 3 (0x3), region = 75 }
 0x20c   :  { %1438 = vsyncpa [#allocation3], 1 }
 0x20d   :  { %1440 = vsyncpa [#allocation3 + $0x1], 1 }

</bundles_post_ra>
